<compile_context>
chip_gen: v6e
topology: v6e:2x2x1
jax: 0.10.0
libtpu: 0.0.40
codegen_flags: <defaults>
</compile_context>

<pallas_src>
import math

import jax
import jax.numpy as jnp
from jax import lax
from jax.experimental import pallas as pl
from jax.experimental.pallas import tpu as pltpu

# Safe everywhere: raises v5e's 16 MiB scoped default, within v7x's 64 MiB physical.
_VMEM_LIMIT = 32 * 1024 * 1024


# ----------------------------- helpers ------------------------------------


def _round_up(x, m):
    return ((x + m - 1) // m) * m


def _pick_tile(dim, align, target):
    """Return (tile, padded_dim): tile is a multiple of `align`, padded_dim a
    multiple of tile. Uses the full (aligned) dim when it fits inside `target`;
    otherwise pads the dim up to a multiple of the target tile — a little extra
    zero padding is far cheaper than degenerate small tiles."""
    target = max(_round_up(target, align), align)
    padded = _round_up(dim, align)
    if padded <= target:
        return padded, padded
    return target, _round_up(dim, target)


def _pad2(t, rows, cols):
    r, c = t.shape
    if r == rows and c == cols:
        return t
    return jnp.pad(t, ((0, rows - r), (0, cols - c)))


def _pad_bias(b, cols):
    b2 = b.reshape(1, -1)
    if b2.shape[1] == cols:
        return b2
    return jnp.pad(b2, ((0, 0), (0, cols - b2.shape[1])))


# ----------------------------- kernels ------------------------------------


def _linear_kernel(x_ref, w_ref, b_ref, o_ref):
    """y = x @ w.T + b. f32 output block is resident across the k axis, so it is
    used directly as the accumulator (no scratch, no finalize copy)."""
    k = pl.program_id(2)

    @pl.when(k == 0)
    def _():
        o_ref[...] = jnp.zeros_like(o_ref)

    # x:(tm,tk) contracted with w:(tn,tk) over the shared tk axis — the MXU
    # consumes the (O, I) layout directly (trans_b), no in-kernel transpose.
    o_ref[...] += lax.dot_general(
        x_ref[...], w_ref[...],
        dimension_numbers=(((1,), (1,)), ((), ())),
        preferred_element_type=jnp.float32)

    @pl.when(k == pl.num_programs(2) - 1)
    def _():
        o_ref[...] += b_ref[...]          # (1, tn) broadcast over (tm, tn)


def _fused_sampled_kernel(x_ref, wmu_ref, wlv_ref, weps_ref,
                          bmu_ref, blv_ref, beps_ref, o_ref):
    """Reparameterized sampling fused into the matmul. Only dispatched when the
    M grid has <= 2 tiles, otherwise pre-sampling is cheaper (see wrapper)."""
    k = pl.program_id(2)

    @pl.when(k == 0)
    def _():
        o_ref[...] = jnp.zeros_like(o_ref)

    w = wmu_ref[...] + weps_ref[...] * jnp.exp(0.5 * wlv_ref[...])   # (tn, tk)
    o_ref[...] += lax.dot_general(
        x_ref[...], w,
        dimension_numbers=(((1,), (1,)), ((), ())),
        preferred_element_type=jnp.float32)

    @pl.when(k == pl.num_programs(2) - 1)
    def _():
        b = bmu_ref[...] + beps_ref[...] * jnp.exp(0.5 * blv_ref[...])  # (1, tn)
        o_ref[...] += b


def _sample_w_kernel(mu_ref, lv_ref, eps_ref, w_ref):
    """Elementwise weight sampling pass: w = mu + eps * exp(0.5 * log_var)."""
    w_ref[...] = mu_ref[...] + eps_ref[...] * jnp.exp(0.5 * lv_ref[...])


# ----------------------------- pallas wrappers -----------------------------


def _sample_weight(mu_p, lv_p, eps_p, tn, tk):
    """Pre-sample the (padded) weight once; output feeds the slim matmul kernel."""
    Op, Ip = mu_p.shape
    spec = pl.BlockSpec((tn, tk), lambda i, j: (i, j))
    return pl.pallas_call(
        _sample_w_kernel,
        out_shape=jax.ShapeDtypeStruct((Op, Ip), jnp.float32),
        grid_spec=pltpu.PrefetchScalarGridSpec(
            num_scalar_prefetch=0,
            grid=(Op // tn, Ip // tk),
            in_specs=[spec, spec, spec],
            out_specs=spec),
        compiler_params=pltpu.CompilerParams(
            dimension_semantics=("parallel", "parallel"),
            vmem_limit_bytes=_VMEM_LIMIT),
        cost_estimate=pl.CostEstimate(
            flops=2 * Op * Ip,
            transcendentals=Op * Ip,
            bytes_accessed=4 * 4 * Op * Ip),
    )(mu_p, lv_p, eps_p)


def _matmul(x_p, w_list, b_list, kernel, tm, tn, tk, fused_sample):
    """Tiled y = x @ w.T + b (w possibly sampled in-kernel). Returns f32 (Mp, Op)."""
    Mp, Ip = x_p.shape
    Op = w_list[0].shape[0]
    gm, gn, gk = Mp // tm, Op // tn, Ip // tk
    nw, nb = len(w_list), len(b_list)

    x_spec = pl.BlockSpec((tm, tk), lambda i, j, k: (i, k))
    w_spec = pl.BlockSpec((tn, tk), lambda i, j, k: (j, k))
    b_spec = pl.BlockSpec((1, tn), lambda i, j, k: (0, j))
    o_spec = pl.BlockSpec((tm, tn), lambda i, j, k: (i, j))

    # Real HBM traffic: x is re-streamed once per j tile, weights once per i tile.
    cost = pl.CostEstimate(
        flops=2 * Mp * Op * Ip,
        transcendentals=(gm * Op * Ip + Op) if fused_sample else 0,
        bytes_accessed=4 * (gn * Mp * Ip + gm * nw * Op * Ip + Mp * Op + nb * Op))

    return pl.pallas_call(
        kernel,
        out_shape=jax.ShapeDtypeStruct((Mp, Op), jnp.float32),
        grid_spec=pltpu.PrefetchScalarGridSpec(
            num_scalar_prefetch=0,
            grid=(gm, gn, gk),
            in_specs=[x_spec] + [w_spec] * nw + [b_spec] * nb,
            out_specs=o_spec),
        compiler_params=pltpu.CompilerParams(
            dimension_semantics=("parallel", "parallel", "arbitrary"),
            vmem_limit_bytes=_VMEM_LIMIT),
        cost_estimate=cost,
    )(x_p, *w_list, *b_list)


def _forward_2d(x2d, w_mu, w_lv, b_mu, b_lv, w_eps, b_eps, sample, out_dtype,
                tm_target, tn_target, tk_target):
    M, I = x2d.shape
    O = w_mu.shape[0]

    tm, Mp = _pick_tile(M, 8, tm_target)
    tn, Op = _pick_tile(O, 128, tn_target)
    tk, Ip = _pick_tile(I, 128, tk_target)
    m_tiles = Mp // tm

    # Zero padding keeps semantics exact: mu = 0, eps = 0, log_var = 0 (exp = 1)
    # -> sampled weight 0; padded x columns multiply zero weights; padded rows /
    # cols are sliced away. Pads are skipped when shapes already align.
    x_p = _pad2(x2d, Mp, Ip)

    if not sample:
        # Point-estimate path: single weight stream, no exp work.
        w_list = (_pad2(w_mu, Op, Ip),)
        b_list = (_pad_bias(b_mu, Op),)
        kernel, fused = _linear_kernel, False
    elif m_tiles <= 2:
        # Few M tiles: fusing the sampling avoids an extra HBM round-trip of w.
        w_list = tuple(_pad2(t, Op, Ip) for t in (w_mu, w_lv, w_eps))
        b_list = tuple(_pad_bias(t, Op) for t in (b_mu, b_lv, b_eps))
        kernel, fused = _fused_sampled_kernel, True
    else:
        # Many M tiles: pre-sample the weight once so the matmul streams one
        # weight tensor per M tile instead of three (and skips per-tile exp/FMA).
        w = _sample_weight(_pad2(w_mu, Op, Ip), _pad2(w_lv, Op, Ip),
                           _pad2(w_eps, Op, Ip), tn, tk)
        b = b_mu + b_eps * jnp.exp(0.5 * b_lv)        # O elems: plain JAX is fine
        w_list = (w,)
        b_list = (_pad_bias(b, Op),)
        kernel, fused = _linear_kernel, False

    out = _matmul(x_p, w_list, b_list, kernel, tm, tn, tk, fused)
    return out[:M, :O].astype(out_dtype)


# ----------------------------- public API -----------------------------------


def mean_field_gaussian_linear(x, w_mu, w_logvar, b_mu, b_logvar, key,
                               sample_parameters=True,
                               tm_target=512, tn_target=512, tk_target=1024):
    """Forward pass of MeanFieldGaussianLinear.

    x: (N, *, in_features) float32
    w_mu, w_logvar: (out_features, in_features)
    b_mu, b_logvar: (out_features,)
    """
    in_features = w_mu.shape[1]
    out_features = w_mu.shape[0]
    lead_shape = x.shape[:-1]
    x2d = x.reshape(-1, in_features)

    if sample_parameters:
        kw, kb = jax.random.split(key)
        w_eps = jax.random.normal(kw, w_mu.shape, dtype=w_mu.dtype)
        b_eps = jax.random.normal(kb, b_mu.shape, dtype=b_mu.dtype)
    else:
        w_eps = b_eps = None

    out = _forward_2d(x2d, w_mu, w_logvar, b_mu, b_logvar, w_eps, b_eps,
                      sample_parameters, x.dtype,
                      tm_target, tn_target, tk_target)
    return out.reshape(*lead_shape, out_features)


def init_parameters(key, in_features, out_features, initial_posterior_variance=1e-3):
    """Deterministic re-implementation of _initialize_posteriors."""
    kw, kb = jax.random.split(key)
    posterior_W_means = 0.1 * jax.random.normal(kw, (out_features, in_features),
                                                dtype=jnp.float32)
    posterior_b_means = jax.random.uniform(kb, (out_features,), dtype=jnp.float32,
                                           minval=-0.1, maxval=0.1)
    posterior_W_log_vars = jnp.full((out_features, in_features),
                                    math.log(initial_posterior_variance),
                                    dtype=jnp.float32)
    posterior_b_log_vars = jnp.full((out_features,),
                                    math.log(initial_posterior_variance),
                                    dtype=jnp.float32)
    return posterior_W_means, posterior_W_log_vars, posterior_b_means, posterior_b_log_vars


def _reference(x, w_mu, w_lv, b_mu, b_lv, key, sample_parameters=True):
    """Pure-JAX reference with the same noise draw."""
    if sample_parameters:
        kw, kb = jax.random.split(key)
        w_eps = jax.random.normal(kw, w_mu.shape, dtype=jnp.float32)
        b_eps = jax.random.normal(kb, b_mu.shape, dtype=jnp.float32)
        w = w_mu + w_eps * jnp.exp(0.5 * w_lv)
        b = b_mu + b_eps * jnp.exp(0.5 * b_lv)
    else:
        w, b = w_mu, b_mu
    x2d = x.reshape(-1, w.shape[1])
    y = lax.dot_general(x2d, w, dimension_numbers=(((1,), (1,)), ((), ())),
                        precision=lax.Precision.HIGHEST) + b
    return y.reshape(*x.shape[:-1], w.shape[0])


if __name__ == "__main__":
    root = jax.random.PRNGKey(0)

    # --- Test 1: small shapes matching the module's demo contract ------------
    in_f, out_f = 32, 16
    k_param, k_x, k_noise = jax.random.split(root, 3)
    w_mu, w_lv, b_mu, b_lv = init_parameters(k_param, in_f, out_f)
    x = jax.random.normal(k_x, (2, 4, in_f), dtype=jnp.float32)

    y = mean_field_gaussian_linear(x, w_mu, w_lv, b_mu, b_lv, k_noise,
                                   sample_parameters=True)
    jax.block_until_ready(y)
    y_ref = _reference(x, w_mu, w_lv, b_mu, b_lv, k_noise, True)
    assert y.shape == (2, 4, out_f)
    assert jnp.allclose(y, y_ref, atol=1e-4, rtol=1e-4)

    y_pt = mean_field_gaussian_linear(x, w_mu, w_lv, b_mu, b_lv, k_noise,
                                      sample_parameters=False)
    jax.block_until_ready(y_pt)
    y_pt_ref = _reference(x, w_mu, w_lv, b_mu, b_lv, k_noise, False)
    assert jnp.allclose(y_pt, y_pt_ref, atol=1e-4, rtol=1e-4)

    # --- Test 2: non-aligned shapes + forced multi-step reduction ------------
    in2, out2 = 200, 72
    k_param2, k_x2, k_noise2 = jax.random.split(jax.random.PRNGKey(1), 3)
    w_mu2, w_lv2, b_mu2, b_lv2 = init_parameters(k_param2, in2, out2)
    x2 = jax.random.normal(k_x2, (3, 5, in2), dtype=jnp.float32)

    y2 = mean_field_gaussian_linear(x2, w_mu2, w_lv2, b_mu2, b_lv2, k_noise2,
                                    sample_parameters=True,
                                    tk_target=128)   # forces >1 reduction step
    jax.block_until_ready(y2)
    y2_ref = _reference(x2, w_mu2, w_lv2, b_mu2, b_lv2, k_noise2, True)
    assert y2.shape == (3, 5, out2)
    assert jnp.allclose(y2, y2_ref, atol=1e-4, rtol=1e-4)

    y2_pt = mean_field_gaussian_linear(x2, w_mu2, w_lv2, b_mu2, b_lv2, k_noise2,
                                       sample_parameters=False, tk_target=128)
    jax.block_until_ready(y2_pt)
    y2_pt_ref = _reference(x2, w_mu2, w_lv2, b_mu2, b_lv2, k_noise2, False)
    assert jnp.allclose(y2_pt, y2_pt_ref, atol=1e-4, rtol=1e-4)

    # --- Test 3: many M tiles -> exercises the pre-sampled weight path -------
    in3, out3 = 256, 192
    k_param3, k_x3, k_noise3 = jax.random.split(jax.random.PRNGKey(2), 3)
    w_mu3, w_lv3, b_mu3, b_lv3 = init_parameters(k_param3, in3, out3)
    x3 = jax.random.normal(k_x3, (4, 32, in3), dtype=jnp.float32)

    y3 = mean_field_gaussian_linear(x3, w_mu3, w_lv3, b_mu3, b_lv3, k_noise3,
                                    sample_parameters=True,
                                    tm_target=32)    # 4 M tiles -> pre-sample path
    jax.block_until_ready(y3)
    y3_ref = _reference(x3, w_mu3, w_lv3, b_mu3, b_lv3, k_noise3, True)
    assert y3.shape == (4, 32, out3)
    assert jnp.allclose(y3, y3_ref, atol=1e-4, rtol=1e-4)

    print("KERNEL_OK")
</pallas_src>

<mosaic_0001>
module attributes {stable_mosaic.version = 11 : i64} {
  func.func @_fused_sampled_kernel(%arg0: i32, %arg1: i32, %arg2: i32, %arg3: memref<8x128xf32, #tpu.memory_space<vmem>>, %arg4: memref<128x128xf32, #tpu.memory_space<vmem>>, %arg5: memref<128x128xf32, #tpu.memory_space<vmem>>, %arg6: memref<128x128xf32, #tpu.memory_space<vmem>>, %arg7: memref<1x128xf32, #tpu.memory_space<vmem>>, %arg8: memref<1x128xf32, #tpu.memory_space<vmem>>, %arg9: memref<1x128xf32, #tpu.memory_space<vmem>>, %arg10: memref<8x128xf32, #tpu.memory_space<vmem>>) attributes {dimension_semantics = [#tpu.dimension_semantics<parallel>, #tpu.dimension_semantics<parallel>, #tpu.dimension_semantics<arbitrary>], iteration_bounds = array<i64: 1, 1, 1>, scalar_prefetch = 0 : i64, scratch_operands = 0 : i64, tpu.core_type = #tpu.core_type<tc>, window_params = [{transform_indices = @transform_0, window_bounds = array<i64: 8, 128>}, {transform_indices = @transform_1, window_bounds = array<i64: 128, 128>}, {transform_indices = @transform_2, window_bounds = array<i64: 128, 128>}, {transform_indices = @transform_3, window_bounds = array<i64: 128, 128>}, {transform_indices = @transform_4, window_bounds = array<i64: 1, 128>}, {transform_indices = @transform_5, window_bounds = array<i64: 1, 128>}, {transform_indices = @transform_6, window_bounds = array<i64: 1, 128>}, {transform_indices = @transform_7, window_bounds = array<i64: 8, 128>}]} {
    %c0_i32 = arith.constant 0 : i32
    %0 = arith.cmpi eq, %arg2, %c0_i32 : i32
    %1 = arith.extui %0 : i1 to i32
    %c0_i32_0 = arith.constant 0 : i32
    %2 = arith.cmpi ne, %1, %c0_i32_0 : i32
    scf.if %2 {
      %cst_15 = arith.constant 0.000000e+00 : f32
      %19 = vector.broadcast %cst_15 : f32 to vector<8x128xf32>
      %c0_16 = arith.constant 0 : index
      %c0_17 = arith.constant 0 : index
      %20 = vector.load %arg10[%c0_16, %c0_17] : memref<8x128xf32, #tpu.memory_space<vmem>>, vector<8x128xf32>
      tpu.vector_store %arg10[%c0_16, %c0_17], %19 {strides = array<i32>} : memref<8x128xf32, #tpu.memory_space<vmem>>, vector<8x128xf32>,
    } else {
    }
    %c0 = arith.constant 0 : index
    %c0_1 = arith.constant 0 : index
    %3 = vector.load %arg4[%c0, %c0_1] : memref<128x128xf32, #tpu.memory_space<vmem>>, vector<128x128xf32>
    %c0_2 = arith.constant 0 : index
    %c0_3 = arith.constant 0 : index
    %4 = vector.load %arg6[%c0_2, %c0_3] : memref<128x128xf32, #tpu.memory_space<vmem>>, vector<128x128xf32>
    %c0_4 = arith.constant 0 : index
    %c0_5 = arith.constant 0 : index
    %5 = vector.load %arg5[%c0_4, %c0_5] : memref<128x128xf32, #tpu.memory_space<vmem>>, vector<128x128xf32>
    %cst = arith.constant 5.000000e-01 : f32
    %6 = vector.broadcast %cst : f32 to vector<128x128xf32>
    %7 = arith.mulf %6, %5 : vector<128x128xf32>
    %8 = math.exp %7 : vector<128x128xf32>
    %9 = arith.mulf %4, %8 : vector<128x128xf32>
    %10 = arith.addf %3, %9 : vector<128x128xf32>
    %c0_6 = arith.constant 0 : index
    %c0_7 = arith.constant 0 : index
    %11 = vector.load %arg10[%c0_6, %c0_7] : memref<8x128xf32, #tpu.memory_space<vmem>>, vector<8x128xf32>
    %c0_8 = arith.constant 0 : index
    %c0_9 = arith.constant 0 : index
    %12 = vector.load %arg3[%c0_8, %c0_9] : memref<8x128xf32, #tpu.memory_space<vmem>>, vector<8x128xf32>
    %cst_10 = arith.constant dense<0.000000e+00> : vector<8x128xf32>
    %13 = tpu.matmul %12, %10, %cst_10 {dimension_numbers = #tpu.dot_dimension_numbers<[1], [1], [0], [0], [0, 0, 1, 0], [], []>} : vector<8x128xf32>, vector<128x128xf32>, vector<8x128xf32> -> vector<8x128xf32>
    %14 = arith.addf %11, %13 : vector<8x128xf32>
    %c0_11 = arith.constant 0 : index
    %c0_12 = arith.constant 0 : index
    %15 = vector.load %arg10[%c0_11, %c0_12] : memref<8x128xf32, #tpu.memory_space<vmem>>, vector<8x128xf32>
    tpu.vector_store %arg10[%c0_11, %c0_12], %14 {strides = array<i32>} : memref<8x128xf32, #tpu.memory_space<vmem>>, vector<8x128xf32>,
    %c0_i32_13 = arith.constant 0 : i32
    %16 = arith.cmpi eq, %arg2, %c0_i32_13 : i32
    %17 = arith.extui %16 : i1 to i32
    %c0_i32_14 = arith.constant 0 : i32
    %18 = arith.cmpi ne, %17, %c0_i32_14 : i32
    scf.if %18 {
      %c0_15 = arith.constant 0 : index
      %c0_16 = arith.constant 0 : index
      %19 = vector.load %arg7[%c0_15, %c0_16] : memref<1x128xf32, #tpu.memory_space<vmem>>, vector<1x128xf32>
      %c0_17 = arith.constant 0 : index
      %c0_18 = arith.constant 0 : index
      %20 = vector.load %arg9[%c0_17, %c0_18] : memref<1x128xf32, #tpu.memory_space<vmem>>, vector<1x128xf32>
      %c0_19 = arith.constant 0 : index
      %c0_20 = arith.constant 0 : index
      %21 = vector.load %arg8[%c0_19, %c0_20] : memref<1x128xf32, #tpu.memory_space<vmem>>, vector<1x128xf32>
      %cst_21 = arith.constant 5.000000e-01 : f32
      %22 = vector.broadcast %cst_21 : f32 to vector<1x128xf32>
      %23 = arith.mulf %22, %21 : vector<1x128xf32>
      %24 = math.exp %23 : vector<1x128xf32>
      %25 = arith.mulf %20, %24 : vector<1x128xf32>
      %26 = arith.addf %19, %25 : vector<1x128xf32>
      %c0_22 = arith.constant 0 : index
      %c0_23 = arith.constant 0 : index
      %27 = vector.load %arg10[%c0_22, %c0_23] : memref<8x128xf32, #tpu.memory_space<vmem>>, vector<8x128xf32>
      %28 = vector.broadcast %26 : vector<1x128xf32> to vector<8x128xf32>
      %29 = arith.addf %27, %28 : vector<8x128xf32>
      %c0_24 = arith.constant 0 : index
      %c0_25 = arith.constant 0 : index
      %30 = vector.load %arg10[%c0_24, %c0_25] : memref<8x128xf32, #tpu.memory_space<vmem>>, vector<8x128xf32>
      tpu.vector_store %arg10[%c0_24, %c0_25], %29 {strides = array<i32>} : memref<8x128xf32, #tpu.memory_space<vmem>>, vector<8x128xf32>,
    } else {
    }
    return
  }
  func.func @transform_0(%arg0: i32, %arg1: i32, %arg2: i32) -> (i32, i32) {
    %c0_i32 = arith.constant 0 : i32
    return %arg0, %arg2 : i32, i32
  }
  func.func @transform_1(%arg0: i32, %arg1: i32, %arg2: i32) -> (i32, i32) {
    %c0_i32 = arith.constant 0 : i32
    return %arg1, %arg2 : i32, i32
  }
  func.func @transform_2(%arg0: i32, %arg1: i32, %arg2: i32) -> (i32, i32) {
    %c0_i32 = arith.constant 0 : i32
    return %arg1, %arg2 : i32, i32
  }
  func.func @transform_3(%arg0: i32, %arg1: i32, %arg2: i32) -> (i32, i32) {
    %c0_i32 = arith.constant 0 : i32
    return %arg1, %arg2 : i32, i32
  }
  func.func @transform_4(%arg0: i32, %arg1: i32, %arg2: i32) -> (i32, i32) {
    %c0_i32 = arith.constant 0 : i32
    %c0_i32_0 = arith.constant 0 : i32
    return %c0_i32, %arg1 : i32, i32
  }
  func.func @transform_5(%arg0: i32, %arg1: i32, %arg2: i32) -> (i32, i32) {
    %c0_i32 = arith.constant 0 : i32
    %c0_i32_0 = arith.constant 0 : i32
    return %c0_i32, %arg1 : i32, i32
  }
  func.func @transform_6(%arg0: i32, %arg1: i32, %arg2: i32) -> (i32, i32) {
    %c0_i32 = arith.constant 0 : i32
    %c0_i32_0 = arith.constant 0 : i32
    return %c0_i32, %arg1 : i32, i32
  }
  func.func @transform_7(%arg0: i32, %arg1: i32, %arg2: i32) -> (i32, i32) {
    %c0_i32 = arith.constant 0 : i32
    return %arg0, %arg1 : i32, i32
  }
}

</mosaic_0001>

<bundles_post_ra>
// kernel: tpu_custom_call.1
= control target key start
LH: loop header
LB: loop body
LE: loop exit
PB: predicated region body
PF: predicated region fallthrough
CT: control target
= control target key end

     0   :  { %12 = vsyncpa [#allocation3], 0  ;;  %s626_s0 = inlined_call_operand.hbm [shape: f32[8,128], index: 0, kind: input, shape index: {}]   ;;  %s627_s1 = inlined_call_operand.hbm [shape: f32[128,128], index: 1, kind: input, shape index: {}]   ;;  %s628_s2 = inlined_call_operand.hbm [shape: f32[128,128], index: 2, kind: input, shape index: {}]   ;;  %s629_s3 = inlined_call_operand.hbm [shape: f32[128,128], index: 3, kind: input, shape index: {}]   ;;  %s630_s4 = inlined_call_operand.vmem [shape: f32[1,128], index: 4, kind: input, shape index: {}]   ;;  %s631_s5 = inlined_call_operand.vmem [shape: f32[1,128], index: 5, kind: input, shape index: {}]   ;;  %s632_s6 = inlined_call_operand.vmem [shape: f32[1,128], index: 6, kind: input, shape index: {}]   ;;  %s633_s7 = inlined_call_operand.hbm [shape: f32[8,128], index: 7, kind: output, shape index: {}]  }
   0x1   :  { %13 = vsyncpa [#allocation6], 0 }
   0x2   :  { %14 = vsyncpa [#allocation9], 0 }
   0x3   :  { %15 = vsyncpa [#allocation4], 0  ;;  %s527_s24 = smov [#allocation5]  }
   0x4   :  { %s31_s25 = sshll.u32 %s527_s24, 4  ;;  %s32_s25 = int_to_ptr.vmem [resolvable:$true] %s31_s25 }
   0x5   :  { %s427_s26 = scalar_lea.vmem %s32_s25, 2048  ;;  %p432_p1 = scmp.lt.s32.totalorder %s32_s25, %s32_s25 }
   0x6   :  { %p428_p0 = scmp.ne.s32.totalorder %s32_s25, %s427_s26  ;;  %p433_p2 = scmp.lt.s32.totalorder %s427_s26, %s427_s26 }
   0x8   :  { %p434_p3 = por %p433_p2, %p432_p1 }
   0xa   :  { %p435_p4 = pnand %p434_p3, %p428_p0 }
   0xc   :  { %438 = shalt.err (!%p435_p4)
}
   0xd   :  { %s528_s27 = smov 128   ;;  %s529_s28 = smov 8  }
   0xe   :  { %37 = dma.hbm_to_vmem [thread:$0]  %s627_s1, 2048, %s32_s25, [#allocation6], %s528_s27, %s528_s27, %s529_s28  }
   0xf   :  { %s530_s8 = smov [#allocation2]   ;;  %s531_s10 = smov [#allocation7]  }
  0x10   :  { %s22_s9 = sshll.u32 %s530_s8, 4  ;;  %s43_s11 = sshll.u32 %s531_s10, 4  ;;  %s23_s9 = int_to_ptr.vmem [resolvable:$true] %s22_s9  ;;  %s44_s11 = int_to_ptr.vmem [resolvable:$true] %s43_s11 }
  0x11   :  { %s447_s12 = scalar_lea.vmem %s23_s9, 128  ;;  %p452_p6 = scmp.lt.s32.totalorder %s23_s9, %s23_s9 }
  0x12   :  { %p448_p5 = scmp.ne.s32.totalorder %s23_s9, %s447_s12  ;;  %p453_p7 = scmp.lt.s32.totalorder %s447_s12, %s447_s12 }
  0x14   :  { %p454_p8 = por %p453_p7, %p452_p6 }
  0x16   :  { %p455_p9 = pnand %p454_p8, %p448_p5 }
  0x18   :  { %458 = shalt.err (!%p455_p9)
}
  0x19   :  { %25 = dma.hbm_to_vmem [thread:$0]  %s626_s0, 128, %s23_s9, [#allocation3]  }
  0x1a   :  { %s467_s15 = scalar_lea.vmem %s44_s11, 2048  ;;  %p472_p11 = scmp.lt.s32.totalorder %s44_s11, %s44_s11 }
  0x1b   :  { %p468_p10 = scmp.ne.s32.totalorder %s44_s11, %s467_s15  ;;  %p473_p12 = scmp.lt.s32.totalorder %s467_s15, %s467_s15 }
  0x1d   :  { %p474_p13 = por %p473_p12, %p472_p11 }
  0x1f   :  { %p475_p0 = pnand %p474_p13, %p468_p10 }
  0x21   :  { %478 = shalt.err (!%p475_p0)
}
  0x22   :  { %49 = dma.hbm_to_vmem [thread:$0]  %s628_s2, 2048, %s44_s11, [#allocation6], %s528_s27, %s528_s27, %s529_s28  }
  0x23   :  { %s532_s17 = smov [#allocation8]  }
  0x24   :  { %s55_s18 = sshll.u32 %s532_s17, 4  ;;  %s56_s18 = int_to_ptr.vmem [resolvable:$true] %s55_s18 }
  0x25   :  { %s487_s19 = scalar_lea.vmem %s56_s18, 2048  ;;  %p492_p2 = scmp.lt.s32.totalorder %s56_s18, %s56_s18 }
  0x26   :  { %p488_p1 = scmp.ne.s32.totalorder %s56_s18, %s487_s19  ;;  %p493_p3 = scmp.lt.s32.totalorder %s487_s19, %s487_s19 }
  0x28   :  { %p494_p4 = por %p493_p3, %p492_p2 }
  0x2a   :  { %p495_p5 = pnand %p494_p4, %p488_p1 }
  0x2c   :  { %498 = shalt.err (!%p495_p5)
}
  0x2d   :  { %61 = dma.hbm_to_vmem [thread:$0]  %s629_s3, 2048, %s56_s18, [#allocation9], %s528_s27, %s528_s27, %s529_s28  }
  0x2e   :  { %519 = dma.done.wait [#allocation3], 128  }
  0x2f   :  { %520 = vsyncadd [#allocation3], 4294967168 }
  0x30   :  { %521 = dma.done.wait [#allocation6], 4096  }
  0x31   :  { %522 = vsyncadd [#allocation6], 4294963200 }
  0x32   :  { %523 = dma.done.wait [#allocation9], 2048  }
  0x33   :  { %524 = vsyncadd [#allocation9], 4294965248  ;;  %v533_v0 = vmov 0.0   ;;  %vm534_vm0 = vmmov 0   ;;  %v132_v1 = vld [vmem:[#allocation7 + $0x78] sm:$0xff]  ;;  %v131_v3 = vld [vmem:[#allocation7 + $0x70] sm:$0xff] }
  0x34   :  { %341 = vmatprep.subr.mxu0 %v533_v0  ;;  %373 = vmatprep.mubr.msk.f32.mxu0 %vm534_vm0, %v533_v0  ;;  %v148_v2 = vmul.f32 0.5, %v132_v1  ;;  %v147_v4 = vmul.f32 0.5, %v131_v3  ;;  %v130_v5 = vld [vmem:[#allocation7 + $0x68] sm:$0xff]  ;;  %v129_v8 = vld [vmem:[#allocation7 + $0x60] sm:$0xff]  ;;  %v128_v11 = vld [vmem:[#allocation7 + $0x58] sm:$0xff] }
  0x35   :  { %v146_v7 = vmul.f32 0.5, %v130_v5  ;;  %v145_v10 = vmul.f32 0.5, %v129_v8  ;;  %v144_v14 = vmul.f32 0.5, %v128_v11  ;;  %v127_v15 = vld [vmem:[#allocation7 + $0x50] sm:$0xff]  ;;  %v126_v18 = vld [vmem:[#allocation7 + $0x48] sm:$0xff]  ;;  %v116_v21 = vld [vmem:[#allocation8 + $0x78] sm:$0xff] }
  0x36   :  { %v179_v6 = vmul.f32 1.442695, %v148_v2  ;;  %v177_v9 = vmul.f32 1.442695, %v147_v4  ;;  %v143_v17 = vmul.f32 0.5, %v127_v15  ;;  %v142_v20 = vmul.f32 0.5, %v126_v18 }
  0x37   :  { %v175_v12 = vmul.f32 1.442695, %v146_v7  ;;  %v173_v13 = vmul.f32 1.442695, %v145_v10  ;;  %v171_v16 = vmul.f32 1.442695, %v144_v14 }
  0x38   :  { %385 = vpow2.f32 %v179_v6  ;;  %v169_v19 = vmul.f32 1.442695, %v143_v17  ;;  %v125_v22 = vld [vmem:[#allocation7 + $0x40] sm:$0xff]  ;;  %v115_v23 = vld [vmem:[#allocation8 + $0x70] sm:$0xff]  ;;  %v100_v25 = vld [vmem:[#allocation5 + $0x78] sm:$0xff] }
  0x39   :  { %387 = vpow2.f32 %v177_v9  ;;  %v167_v28 = vmul.f32 1.442695, %v142_v20  ;;  %v141_v29 = vmul.f32 0.5, %v125_v22  ;;  %v124_v30 = vld [vmem:[#allocation7 + $0x38] sm:$0xff]  ;;  %v99_v32 = vld [vmem:[#allocation5 + $0x70] sm:$0xff]  ;;  %v114_v34 = vld [vmem:[#allocation8 + $0x68] sm:$0xff] }
  0x3a   :  { %389 = vpow2.f32 %v175_v12  ;;  %v140_v36 = vmul.f32 0.5, %v124_v30  ;;  %v123_v40 = vld [vmem:[#allocation7 + $0x30] sm:$0xff]  ;;  %v98_v42 = vld [vmem:[#allocation5 + $0x68] sm:$0xff]  ;;  %v113_v43 = vld [vmem:[#allocation8 + $0x60] sm:$0xff] }
  0x3b   :  { %391 = vpow2.f32 %v173_v13  ;;  %v165_v39 = vmul.f32 1.442695, %v141_v29  ;;  %v139_v44 = vmul.f32 0.5, %v123_v40  ;;  %v122_v48 = vld [vmem:[#allocation7 + $0x28] sm:$0xff]  ;;  %v97_v50 = vld [vmem:[#allocation5 + $0x60] sm:$0xff]  ;;  %v112_v51 = vld [vmem:[#allocation8 + $0x58] sm:$0xff] }
  0x3c   :  { %393 = vpow2.f32 %v171_v16  ;;  %v163_v47 = vmul.f32 1.442695, %v140_v36  ;;  %v138_v52 = vmul.f32 0.5, %v122_v48  ;;  %v121_v56 = vld [vmem:[#allocation7 + $0x20] sm:$0xff]  ;;  %v96_v58 = vld [vmem:[#allocation5 + $0x58] sm:$0xff]  ;;  %v111_v59 = vld [vmem:[#allocation8 + $0x50] sm:$0xff] }
  0x3d   :  { %395 = vpow2.f32 %v169_v19  ;;  %v161_v55 = vmul.f32 1.442695, %v139_v44  ;;  %v137_v60 = vmul.f32 0.5, %v121_v56  ;;  %v120_v1 = vld [vmem:[#allocation7 + $0x18] sm:$0xff]  ;;  %v95_v3 = vld [vmem:[#allocation5 + $0x50] sm:$0xff]  ;;  %v110_v4 = vld [vmem:[#allocation8 + $0x48] sm:$0xff] }
  0x3e   :  { %397 = vpow2.f32 %v167_v28  ;;  %v159_v63 = vmul.f32 1.442695, %v138_v52  ;;  %v136_v5 = vmul.f32 0.5, %v120_v1  ;;  %v119_v9 = vld [vmem:[#allocation7 + $0x10] sm:$0xff]  ;;  %v94_v11 = vld [vmem:[#allocation5 + $0x48] sm:$0xff]  ;;  %v109_v12 = vld [vmem:[#allocation8 + $0x40] sm:$0xff] }
  0x3f   :  { %399 = vpow2.f32 %v165_v39  ;;  %v157_v8 = vmul.f32 1.442695, %v137_v60  ;;  %v135_v13 = vmul.f32 0.5, %v119_v9  ;;  %v118_v17 = vld [vmem:[#allocation7 + $0x8] sm:$0xff]  ;;  %v93_v19 = vld [vmem:[#allocation5 + $0x40] sm:$0xff]  ;;  %v108_v20 = vld [vmem:[#allocation8 + $0x38] sm:$0xff] }
  0x40   :  { %401 = vpow2.f32 %v163_v47  ;;  %v155_v16 = vmul.f32 1.442695, %v136_v5  ;;  %v107_v28 = vld [vmem:[#allocation8 + $0x30] sm:$0xff]  ;;  %v90_v40 = vld [vmem:[#allocation5 + $0x28] sm:$0xff]  ;;  %v85_v1 = vld [vmem:[#allocation5] sm:$0xff] }
  0x41   :  { %403 = vpow2.f32 %v161_v55  ;;  %v87_v55 = vld [vmem:[#allocation5 + $0x10] sm:$0xff]  ;;  %v102_v56 = vld [vmem:[#allocation8 + $0x8] sm:$0xff]  ;;  %v291_v9 = vld [vmem:[%s632_s6] sm:$0x1] }
  0x42   :  { %405 = vpow2.f32 %v159_v63  ;;  %v86_v60 = vld [vmem:[#allocation5 + $0x8] sm:$0xff] }
  0x43   :  { %407 = vpow2.f32 %v157_v8 }
  0x44   :  { %409 = vpow2.f32 %v155_v16 }
  0x45   :  { %v386_v24 = vpop.eup %385 }
  0x46   :  { %v388_v26 = vpop.eup %387  ;;  %v196_v27 = vmul.f32 %v386_v24, %v116_v21  ;;  %v134_v21 = vmul.f32 0.5, %v118_v17  ;;  %v153_v24 = vmul.f32 1.442695, %v135_v13 }
  0x47   :  { %v390_v31 = vpop.eup %389  ;;  %v195_v33 = vmul.f32 %v388_v26, %v115_v23 }
  0x48   :  { %v212_v35 = vadd.f32 %v196_v27, %v100_v25  ;;  %v194_v38 = vmul.f32 %v390_v31, %v114_v34  ;;  %v392_v41 = vpop.eup %391  ;;  %v117_v25 = vld [vmem:[#allocation7] sm:$0xff]  ;;  %v92_v27 = vld [vmem:[#allocation5 + $0x38] sm:$0xff]  ;;  %411 = vpow2.f32 %v153_v24  ;;  %v91_v34 = vld [vmem:[#allocation5 + $0x30] sm:$0xff] }
  0x49   :  { %v211_v37 = vadd.f32 %v195_v33, %v99_v32  ;;  %v193_v46 = vmul.f32 %v392_v41, %v113_v43  ;;  %v394_v49 = vpop.eup %393  ;;  %v133_v29 = vmul.f32 0.5, %v117_v25  ;;  %v151_v32 = vmul.f32 1.442695, %v134_v21  ;;  %v105_v41 = vld [vmem:[#allocation8 + $0x20] sm:$0xff] }
  0x4a   :  { %342 = vmatpush3.xpose.msra.mxu0 %v212_v35  ;;  %v210_v45 = vadd.f32 %v194_v38, %v98_v42  ;;  %v192_v54 = vmul.f32 %v394_v49, %v112_v51  ;;  %v396_v57 = vpop.eup %395  ;;  %v106_v35 = vld [vmem:[#allocation8 + $0x28] sm:$0xff]  ;;  %v103_v51 = vld [vmem:[#allocation8 + $0x10] sm:$0xff] }
  0x4b   :  { %343 = vmatprep.subr.mxu0 %v533_v0  ;;  %v209_v53 = vadd.f32 %v193_v46, %v97_v50  ;;  %v191_v62 = vmul.f32 %v396_v57, %v111_v59  ;;  %v398_v2 = vpop.eup %397  ;;  %413 = vpow2.f32 %v151_v32  ;;  %v149_v38 = vmul.f32 1.442695, %v133_v29  ;;  %v104_v46 = vld [vmem:[#allocation8 + $0x18] sm:$0xff] }
  0x4c   :  { %v208_v61 = vadd.f32 %v192_v54, %v96_v58  ;;  %v190_v7 = vmul.f32 %v398_v2, %v110_v4  ;;  %v400_v10 = vpop.eup %399  ;;  %v88_v50 = vld [vmem:[#allocation5 + $0x18] sm:$0xff] }
  0x4d   :  { %v207_v6 = vadd.f32 %v191_v62, %v95_v3  ;;  %v189_v15 = vmul.f32 %v400_v10, %v109_v12  ;;  %v402_v18 = vpop.eup %401  ;;  %415 = vpow2.f32 %v149_v38  ;;  %v214_v3 = vld [vmem:[#allocation2] sm:$0xff] }
  0x4e   :  { %344 = vmatpush3.xpose.msra.mxu0 %v211_v37  ;;  %v206_v14 = vadd.f32 %v190_v7, %v94_v11  ;;  %v188_v23 = vmul.f32 %v402_v18, %v108_v20  ;;  %v404_v26 = vpop.eup %403  ;;  %v292_v4 = vld [vmem:[%s631_s5] sm:$0x1]  ;;  %v300_v7 = vlaneseq  ;;  %s535_s5 = smov [#allocation10]  }
  0x4f   :  { %345 = vmatprep.subr.mxu0 %v533_v0  ;;  %v205_v22 = vadd.f32 %v189_v15, %v93_v19  ;;  %v187_v31 = vmul.f32 %v404_v26, %v107_v28  ;;  %v406_v33 = vpop.eup %405  ;;  %v293_v5 = vmul.f32 0.5, %v292_v4  ;;  %s313_s25 = sshll.u32 %s535_s5, 4  ;;  %s314_s25 = int_to_ptr.vmem [resolvable:$true] %s313_s25 }
  0x50   :  { %v204_v30 = vadd.f32 %v188_v23, %v92_v27  ;;  %v186_v37 = vmul.f32 %v406_v33, %v106_v35  ;;  %v408_v39 = vpop.eup %407  ;;  %v301_v11 = vshrl.u32 %v300_v7, 7  ;;  %s499_s26 = scalar_lea.vmem %s314_s25, 128  ;;  %p504_p7 = scmp.lt.s32.totalorder %s314_s25, %s314_s25 }
  0x51   :  { %v203_v36 = vadd.f32 %v187_v31, %v91_v34  ;;  %v185_v43 = vmul.f32 %v408_v39, %v105_v41  ;;  %v410_v44 = vpop.eup %409  ;;  %p500_p6 = scmp.ne.s32.totalorder %s314_s25, %s499_s26  ;;  %p505_p8 = scmp.lt.s32.totalorder %s499_s26, %s499_s26 }
  0x52   :  { %346 = vmatpush3.xpose.msra.mxu0 %v210_v45  ;;  %v202_v42 = vadd.f32 %v186_v37, %v90_v40  ;;  %v89_v45 = vld [vmem:[#allocation5 + $0x20] sm:$0xff]  ;;  %v184_v48 = vmul.f32 %v410_v44, %v104_v46  ;;  %v302_v13 = vsub.s32 0, %v301_v11 }
  0x53   :  { %347 = vmatprep.subr.mxu0 %v533_v0  ;;  %v201_v47 = vadd.f32 %v185_v43, %v89_v45  ;;  %p506_p9 = por %p505_p8, %p504_p7 }
  0x54   :  { %v200_v52 = vadd.f32 %v184_v48, %v88_v50 }
  0x55   :  { %v412_v49 = vpop.eup %411  ;;  %p507_p10 = pnand %p506_p9, %p500_p6 }
  0x56   :  { %348 = vmatpush3.xpose.msra.mxu0 %v209_v53  ;;  %v183_v53 = vmul.f32 %v412_v49, %v103_v51 }
  0x57   :  { %349 = vmatprep.subr.mxu0 %v533_v0 }
  0x58   :  { %v414_v54 = vpop.eup %413  ;;  %v199_v57 = vadd.f32 %v183_v53, %v87_v55 }
  0x59   :  { %v182_v58 = vmul.f32 %v414_v54, %v102_v56 }
  0x5a   :  { %350 = vmatpush3.xpose.msra.mxu0 %v208_v61  ;;  %v416_v59 = vpop.eup %415  ;;  %v101_v61 = vld [vmem:[#allocation8] sm:$0xff] }
  0x5b   :  { %351 = vmatprep.subr.mxu0 %v533_v0  ;;  %v198_v62 = vadd.f32 %v182_v58, %v86_v60  ;;  %v181_v63 = vmul.f32 %v416_v59, %v101_v61 }
  0x5d   :  { %v197_v2 = vadd.f32 %v181_v63, %v85_v1 }
  0x5e   :  { %352 = vmatpush3.xpose.msra.mxu0 %v207_v6  ;;  %v294_v6 = vmul.f32 1.442695, %v293_v5 }
  0x5f   :  { %353 = vmatprep.subr.mxu0 %v533_v0 }
  0x60   :  { %417 = vpow2.f32 %v294_v6 }
  0x62   :  { %354 = vmatpush3.xpose.msra.mxu0 %v206_v14 }
  0x63   :  { %355 = vmatprep.subr.mxu0 %v533_v0 }
  0x66   :  { %356 = vmatpush3.xpose.msra.mxu0 %v205_v22 }
  0x67   :  { %357 = vmatprep.subr.mxu0 %v533_v0 }
  0x6a   :  { %358 = vmatpush3.xpose.msra.mxu0 %v204_v30 }
  0x6b   :  { %359 = vmatprep.subr.mxu0 %v533_v0 }
  0x6d   :  { %v418_v8 = vpop.eup %417 }
  0x6e   :  { %360 = vmatpush3.xpose.msra.mxu0 %v203_v36  ;;  %v296_v10 = vmul.f32 %v418_v8, %v291_v9 }
  0x6f   :  { %361 = vmatprep.subr.mxu0 %v533_v0 }
  0x72   :  { %362 = vmatpush3.xpose.msra.mxu0 %v202_v42 }
  0x73   :  { %363 = vmatprep.subr.mxu0 %v533_v0 }
  0x76   :  { %364 = vmatpush3.xpose.msra.mxu0 %v201_v47 }
  0x77   :  { %365 = vmatprep.subr.mxu0 %v533_v0 }
  0x7a   :  { %366 = vmatpush3.xpose.msra.mxu0 %v200_v52 }
  0x7b   :  { %367 = vmatprep.subr.mxu0 %v533_v0 }
  0x7e   :  { %368 = vmatpush3.xpose.msra.mxu0 %v199_v57 }
  0x7f   :  { %369 = vmatprep.subr.mxu0 %v533_v0 }
  0x82   :  { %370 = vmatpush3.xpose.msra.mxu0 %v198_v62 }
  0x83   :  { %371 = vmatprep.subr.mxu0 %v533_v0  ;;  %v290_v0 = vld [vmem:[%s630_s4] sm:$0x1] }
  0x84   :  { %v297_v12 = vadd.f32 %v296_v10, %v290_v0 }
  0x86   :  { %372 = vmatpush3.xpose.msra.mxu0 %v197_v2  ;;  %v303_v14 = vrot.slane %v297_v12, %v302_v13 }
  0x89   :  { %374 = vmatmul.mubr.f32.vlgmr.msra.gmra.mxu0 %v214_v3 }
 0x149   :  { %v281_v15 = vpop.f32.mrf.mxu0 }
 0x14a   :  { %v305_v17 = vadd.f32 %v303_v14, %v281_v15 }
 0x14b   :  { %v375_v16 = vpop.f32.mrf.mxu0 }
 0x14c   :  { %306 = vst [vmem:[#allocation10] sm:$0xff] %v305_v17 }
 0x14d   :  { %510 = shalt.err (!%p507_p10)
}
 0x14e   :  { %316 = dma.vmem_to_hbm [thread:$0]  %s314_s25, 128, %s633_s7, [#allocation4]  }
 0x14f   :  { %525 = dma.done.wait [#allocation4], 128  }
 0x150   :  { %526 = vsyncadd [#allocation4], 4294967168 }
 0x151   :  { %320 = vsyncpa [#allocation3], 1 }
 0x152   :  { %321 = vsyncpa [#allocation6], 1 }
 0x153   :  { %322 = vsyncpa [#allocation9], 1 }
 0x154   :  { %323 = vsyncpa [#allocation4], 1 }

</bundles_post_ra>
